<compile_context>
chip_gen: v6e
topology: v6e:2x2x1
jax: 0.10.0
libtpu: 0.0.40
codegen_flags: <defaults>
</compile_context>

<pallas_src>
import functools
import math

import jax
import jax.numpy as jnp
from jax import lax
from jax.experimental import pallas as pl
from jax.experimental.pallas import tpu as pltpu


def _mhsa_kernel(x_ref, wq_ref, wk_ref, wv_ref, wo_ref, cos_ref, sin_ref,
                 o_ref, *, num_heads):
    _, S, H = x_ref.shape
    hd = H // num_heads

    x = x_ref[0]                                    # (S, H) f32
    xb = x.astype(jnp.bfloat16)

    # Fused (all-heads) projections: bf16 operands, f32 accumulate.
    q = jnp.dot(xb, wq_ref[...], preferred_element_type=jnp.float32)   # (S, H)
    k = jnp.dot(xb, wk_ref[...], preferred_element_type=jnp.float32)   # (S, H)
    v = jnp.dot(xb, wv_ref[...], preferred_element_type=jnp.float32)   # (S, H)

    def to_heads(t):                                # (S, H) -> (NH, S, hd)
        return jnp.transpose(t.reshape(S, num_heads, hd), (1, 0, 2))

    q3, k3, v3 = to_heads(q), to_heads(k), to_heads(v)

    # RoPE in split-half layout (weights' columns pre-permuted host-side):
    #   out_first  = even*cos - odd*sin
    #   out_second = odd*cos  + even*sin
    # The partner term is a half-rotation along the head dim (slice + concat,
    # no MXU).  q/k share the permutation so q.k^T is unchanged.
    cos = cos_ref[...][None]                        # (1, S, hd)  [cos | cos]
    sin = sin_ref[...][None]                        # (1, S, hd)  [-sin | sin]

    def rope(t):
        partner = jnp.concatenate([t[..., hd // 2:], t[..., :hd // 2]], axis=-1)
        return t * cos + partner * sin

    q3 = rope(q3)
    k3 = rope(k3)

    # Causal scaled-dot-product attention over all heads at once.
    scale = 1.0 / math.sqrt(hd)
    s = jnp.einsum("hqd,hkd->hqk",
                   q3.astype(jnp.bfloat16), k3.astype(jnp.bfloat16),
                   preferred_element_type=jnp.float32) * scale          # (NH,S,S)
    row = lax.broadcasted_iota(jnp.int32, s.shape, 1)
    col = lax.broadcasted_iota(jnp.int32, s.shape, 2)
    s = jnp.where(col <= row, s, -jnp.inf)

    m = jnp.max(s, axis=-1, keepdims=True)
    p = jnp.exp(s - m)
    denom = jnp.sum(p, axis=-1, keepdims=True)
    p = p * pl.reciprocal(denom, approx=True)

    o3 = jnp.einsum("hqk,hkd->hqd",
                    p.astype(jnp.bfloat16), v3.astype(jnp.bfloat16),
                    preferred_element_type=jnp.float32)                 # (NH,S,hd)

    # Concatenate heads and do a single output projection.
    o2 = jnp.transpose(o3, (1, 0, 2)).reshape(S, H)                     # (S, H)
    out = jnp.dot(o2.astype(jnp.bfloat16), wo_ref[...],
                  preferred_element_type=jnp.float32)                   # (S, H)
    o_ref[...] = out[None].astype(o_ref.dtype)


def mhsa_pallas(x, wq_sh, wk_sh, wv_t, wo_t, cos_sh, sin_sh, num_heads):
    B, S, H = x.shape
    hd = H // num_heads

    grid_spec = pltpu.PrefetchScalarGridSpec(
        num_scalar_prefetch=0,
        grid=(B,),
        in_specs=[
            pl.BlockSpec((1, S, H), lambda b: (b, 0, 0)),   # x (per batch)
            pl.BlockSpec((H, H), lambda b: (0, 0)),         # Wq (split-half cols)
            pl.BlockSpec((H, H), lambda b: (0, 0)),         # Wk (split-half cols)
            pl.BlockSpec((H, H), lambda b: (0, 0)),         # Wv
            pl.BlockSpec((H, H), lambda b: (0, 0)),         # Wo
            pl.BlockSpec((S, hd), lambda b: (0, 0)),        # cos (split-half)
            pl.BlockSpec((S, hd), lambda b: (0, 0)),        # signed sin
        ],
        out_specs=pl.BlockSpec((1, S, H), lambda b: (b, 0, 0)),
    )

    kernel = functools.partial(_mhsa_kernel, num_heads=num_heads)
    return pl.pallas_call(
        kernel,
        out_shape=jax.ShapeDtypeStruct((B, S, H), jnp.float32),
        grid_spec=grid_spec,
        compiler_params=pltpu.CompilerParams(
            dimension_semantics=("parallel",)),
    )(x, wq_sh, wk_sh, wv_t, wo_t, cos_sh, sin_sh)


def rope_tables(seq_len, head_dim):
    """cos/sin tables matching RotaryPositionalEmbedding (base 10000)."""
    freqs = 1.0 / (10000.0 ** (2.0 * jnp.arange(head_dim // 2, dtype=jnp.float32)
                               / head_dim))
    pos = jnp.arange(seq_len, dtype=jnp.float32)
    theta = pos[:, None] * freqs[None, :]               # (S, hd/2)
    return jnp.cos(theta), jnp.sin(theta)


def reference_mhsa(x, Wq, Wk, Wv, Wo, num_heads, cos, sin):
    """Pure-JAX mirror of the PyTorch forward (for verification, f32)."""
    B, S, H = x.shape
    hd = H // num_heads
    q = x @ Wq.T
    k = x @ Wk.T
    v = x @ Wv.T

    def split(t):
        return t.reshape(B, S, num_heads, hd).transpose(0, 2, 1, 3)

    q, k, v = split(q), split(k), split(v)

    def rope(t):
        t2 = t.reshape(B, num_heads, S, hd // 2, 2)
        c = cos[None, None]
        s = sin[None, None]
        x0 = t2[..., 0] * c - t2[..., 1] * s
        x1 = t2[..., 0] * s + t2[..., 1] * c
        return jnp.stack([x0, x1], axis=-1).reshape(B, num_heads, S, hd)

    q, k = rope(q), rope(k)
    scale = 1.0 / math.sqrt(hd)
    s = jnp.einsum("bhqd,bhkd->bhqk", q, k) * scale
    mask = jnp.tril(jnp.ones((S, S), dtype=bool))
    s = jnp.where(mask, s, -jnp.inf)
    p = jax.nn.softmax(s, axis=-1)
    o = jnp.einsum("bhqk,bhkd->bhqd", p, v)
    o = o.transpose(0, 2, 1, 3).reshape(B, S, H)
    return o @ Wo.T


if __name__ == "__main__":
    # Small shapes consistent with the module: hidden=32, heads=4 (head_dim=8).
    B, S, H, NH = 2, 8, 32, 4
    HD = H // NH

    key = jax.random.PRNGKey(0)
    kx, kq, kk, kv, ko = jax.random.split(key, 5)
    bound = 1.0 / math.sqrt(H)
    x = jax.random.normal(kx, (B, S, H), dtype=jnp.float32)
    Wq = jax.random.uniform(kq, (H, H), jnp.float32, -bound, bound)  # torch (out,in)
    Wk = jax.random.uniform(kk, (H, H), jnp.float32, -bound, bound)
    Wv = jax.random.uniform(kv, (H, H), jnp.float32, -bound, bound)
    Wo = jax.random.uniform(ko, (H, H), jnp.float32, -bound, bound)

    # Kernel weight layouts ("x @ W" form, bf16 for the MXU).
    # q/k columns are re-ordered per head into split-half RoPE layout
    # (even dims first, then odd dims) so the in-kernel pair swap is a roll.
    within = jnp.concatenate([jnp.arange(0, HD, 2), jnp.arange(1, HD, 2)])
    perm = (jnp.arange(NH)[:, None] * HD + within[None, :]).reshape(-1)   # (H,)
    wq_sh = Wq.T[:, perm].astype(jnp.bfloat16)      # (H, H)
    wk_sh = Wk.T[:, perm].astype(jnp.bfloat16)      # (H, H)
    wv_t = Wv.T.astype(jnp.bfloat16)                # (H, H)
    wo_t = Wo.T.astype(jnp.bfloat16)                # (H, H)

    cos, sin = rope_tables(S, HD)                   # (S, HD/2)
    cos_sh = jnp.concatenate([cos, cos], axis=-1)   # (S, HD)
    sin_sh = jnp.concatenate([-sin, sin], axis=-1)  # (S, HD)

    out = mhsa_pallas(x, wq_sh, wk_sh, wv_t, wo_t, cos_sh, sin_sh, NH)
    out = jax.block_until_ready(out)

    ref = reference_mhsa(x, Wq, Wk, Wv, Wo, NH, cos, sin)
    max_err = jnp.max(jnp.abs(out - ref))
    # bf16 matmul operands (f32 accumulation) -> loosened tolerance vs f32 ref.
    assert jnp.allclose(out, ref, rtol=2e-2, atol=2e-2), f"max abs err {max_err}"

    print("KERNEL_OK")
</pallas_src>

<mosaic_0001>
module attributes {stable_mosaic.version = 11 : i64} {
  func.func @_mhsa_kernel(%arg0: i32, %arg1: memref<1x8x32xf32, #tpu.memory_space<vmem>>, %arg2: memref<32x32xbf16, #tpu.memory_space<vmem>>, %arg3: memref<32x32xbf16, #tpu.memory_space<vmem>>, %arg4: memref<32x32xbf16, #tpu.memory_space<vmem>>, %arg5: memref<32x32xbf16, #tpu.memory_space<vmem>>, %arg6: memref<8x8xf32, #tpu.memory_space<vmem>>, %arg7: memref<8x8xf32, #tpu.memory_space<vmem>>, %arg8: memref<1x8x32xf32, #tpu.memory_space<vmem>>) attributes {dimension_semantics = [#tpu.dimension_semantics<parallel>], iteration_bounds = array<i64: 2>, scalar_prefetch = 0 : i64, scratch_operands = 0 : i64, tpu.core_type = #tpu.core_type<tc>, window_params = [{transform_indices = @transform_0, window_bounds = array<i64: 1, 8, 32>}, {pipeline_mode = #tpu.pipeline_mode<synchronous>, transform_indices = @transform_1, window_bounds = array<i64: 32, 32>}, {pipeline_mode = #tpu.pipeline_mode<synchronous>, transform_indices = @transform_2, window_bounds = array<i64: 32, 32>}, {pipeline_mode = #tpu.pipeline_mode<synchronous>, transform_indices = @transform_3, window_bounds = array<i64: 32, 32>}, {pipeline_mode = #tpu.pipeline_mode<synchronous>, transform_indices = @transform_4, window_bounds = array<i64: 32, 32>}, {pipeline_mode = #tpu.pipeline_mode<synchronous>, transform_indices = @transform_5, window_bounds = array<i64: 8, 8>}, {pipeline_mode = #tpu.pipeline_mode<synchronous>, transform_indices = @transform_6, window_bounds = array<i64: 8, 8>}, {transform_indices = @transform_7, window_bounds = array<i64: 1, 8, 32>}]} {
    %c0 = arith.constant 0 : index
    %c0_0 = arith.constant 0 : index
    %c0_1 = arith.constant 0 : index
    %0 = vector.load %arg1[%c0, %c0_0, %c0_1] : memref<1x8x32xf32, #tpu.memory_space<vmem>>, vector<1x8x32xf32>
    %1 = vector.shape_cast %0 : vector<1x8x32xf32> to vector<8x32xf32>
    %2 = arith.truncf %1 : vector<8x32xf32> to vector<8x32xbf16>
    %c0_2 = arith.constant 0 : index
    %c0_3 = arith.constant 0 : index
    %3 = vector.load %arg2[%c0_2, %c0_3] : memref<32x32xbf16, #tpu.memory_space<vmem>>, vector<32x32xbf16>
    %cst = arith.constant dense<0.000000e+00> : vector<8x32xf32>
    %4 = tpu.matmul %2, %3, %cst {dimension_numbers = #tpu.dot_dimension_numbers<[1], [0], [0], [1], [0, 0, 1, 1], [], []>} : vector<8x32xbf16>, vector<32x32xbf16>, vector<8x32xf32> -> vector<8x32xf32>
    %c0_4 = arith.constant 0 : index
    %c0_5 = arith.constant 0 : index
    %5 = vector.load %arg3[%c0_4, %c0_5] : memref<32x32xbf16, #tpu.memory_space<vmem>>, vector<32x32xbf16>
    %cst_6 = arith.constant dense<0.000000e+00> : vector<8x32xf32>
    %6 = tpu.matmul %2, %5, %cst_6 {dimension_numbers = #tpu.dot_dimension_numbers<[1], [0], [0], [1], [0, 0, 1, 1], [], []>} : vector<8x32xbf16>, vector<32x32xbf16>, vector<8x32xf32> -> vector<8x32xf32>
    %c0_7 = arith.constant 0 : index
    %c0_8 = arith.constant 0 : index
    %7 = vector.load %arg4[%c0_7, %c0_8] : memref<32x32xbf16, #tpu.memory_space<vmem>>, vector<32x32xbf16>
    %cst_9 = arith.constant dense<0.000000e+00> : vector<8x32xf32>
    %8 = tpu.matmul %2, %7, %cst_9 {dimension_numbers = #tpu.dot_dimension_numbers<[1], [0], [0], [1], [0, 0, 1, 1], [], []>} : vector<8x32xbf16>, vector<32x32xbf16>, vector<8x32xf32> -> vector<8x32xf32>
    %9 = vector.shape_cast %4 : vector<8x32xf32> to vector<8x4x8xf32>
    %10 = tpu.transpose %9, [1, 0, 2] : vector<8x4x8xf32> -> vector<4x8x8xf32>
    %11 = vector.shape_cast %6 : vector<8x32xf32> to vector<8x4x8xf32>
    %12 = tpu.transpose %11, [1, 0, 2] : vector<8x4x8xf32> -> vector<4x8x8xf32>
    %13 = vector.shape_cast %8 : vector<8x32xf32> to vector<8x4x8xf32>
    %14 = tpu.transpose %13, [1, 0, 2] : vector<8x4x8xf32> -> vector<4x8x8xf32>
    %c0_10 = arith.constant 0 : index
    %c0_11 = arith.constant 0 : index
    %15 = vector.load %arg6[%c0_10, %c0_11] : memref<8x8xf32, #tpu.memory_space<vmem>>, vector<8x8xf32>
    %16 = vector.shape_cast %15 : vector<8x8xf32> to vector<1x8x8xf32>
    %c0_12 = arith.constant 0 : index
    %c0_13 = arith.constant 0 : index
    %17 = vector.load %arg7[%c0_12, %c0_13] : memref<8x8xf32, #tpu.memory_space<vmem>>, vector<8x8xf32>
    %18 = vector.shape_cast %17 : vector<8x8xf32> to vector<1x8x8xf32>
    %19 = vector.extract_strided_slice %10 {offsets = [0, 0, 4], sizes = [4, 8, 4], strides = [1, 1, 1]} : vector<4x8x8xf32> to vector<4x8x4xf32>
    %20 = vector.extract_strided_slice %10 {offsets = [0, 0, 0], sizes = [4, 8, 4], strides = [1, 1, 1]} : vector<4x8x8xf32> to vector<4x8x4xf32>
    %21 = tpu.concatenate %19, %20 in 2 : vector<4x8x4xf32>, vector<4x8x4xf32> -> vector<4x8x8xf32>
    %22 = vector.broadcast %16 : vector<1x8x8xf32> to vector<4x8x8xf32>
    %23 = arith.mulf %10, %22 : vector<4x8x8xf32>
    %24 = vector.broadcast %18 : vector<1x8x8xf32> to vector<4x8x8xf32>
    %25 = arith.mulf %21, %24 : vector<4x8x8xf32>
    %26 = arith.addf %23, %25 : vector<4x8x8xf32>
    %27 = vector.extract_strided_slice %12 {offsets = [0, 0, 4], sizes = [4, 8, 4], strides = [1, 1, 1]} : vector<4x8x8xf32> to vector<4x8x4xf32>
    %28 = vector.extract_strided_slice %12 {offsets = [0, 0, 0], sizes = [4, 8, 4], strides = [1, 1, 1]} : vector<4x8x8xf32> to vector<4x8x4xf32>
    %29 = tpu.concatenate %27, %28 in 2 : vector<4x8x4xf32>, vector<4x8x4xf32> -> vector<4x8x8xf32>
    %30 = vector.broadcast %16 : vector<1x8x8xf32> to vector<4x8x8xf32>
    %31 = arith.mulf %12, %30 : vector<4x8x8xf32>
    %32 = vector.broadcast %18 : vector<1x8x8xf32> to vector<4x8x8xf32>
    %33 = arith.mulf %29, %32 : vector<4x8x8xf32>
    %34 = arith.addf %31, %33 : vector<4x8x8xf32>
    %35 = arith.truncf %26 : vector<4x8x8xf32> to vector<4x8x8xbf16>
    %36 = arith.truncf %34 : vector<4x8x8xf32> to vector<4x8x8xbf16>
    "tpu.trace_start"() <{level = 10 : i32, message = "hqd,hkd->hqk"}> : () -> ()
    %cst_14 = arith.constant dense<0.000000e+00> : vector<4x8x8xf32>
    %37 = tpu.matmul %35, %36, %cst_14 {dimension_numbers = #tpu.dot_dimension_numbers<[2], [2], [1], [1], [0, 0, 0, 1, 1, 1], [0], [0]>} : vector<4x8x8xbf16>, vector<4x8x8xbf16>, vector<4x8x8xf32> -> vector<4x8x8xf32>
    "tpu.trace_stop"() : () -> ()
    %cst_15 = arith.constant 0.353553385 : f32
    %38 = vector.broadcast %cst_15 : f32 to vector<4x8x8xf32>
    %39 = arith.mulf %37, %38 : vector<4x8x8xf32>
    %40 = tpu.iota {dimensions = array<i32: 1>} : vector<4x8x8xi32>
    %41 = tpu.iota {dimensions = array<i32: 2>} : vector<4x8x8xi32>
    %42 = arith.cmpi sle, %41, %40 : vector<4x8x8xi32>
    %cst_16 = arith.constant 0xFF800000 : f32
    %43 = vector.broadcast %cst_16 : f32 to vector<4x8x8xf32>
    %44 = arith.select %42, %39, %43 : vector<4x8x8xi1>, vector<4x8x8xf32>
    %cst_17 = arith.constant dense<0xFF800000> : vector<4x8xf32>
    %45 = vector.multi_reduction <maximumf>, %44, %cst_17 [2] : vector<4x8x8xf32> to vector<4x8xf32>
    %46 = vector.shape_cast %45 : vector<4x8xf32> to vector<4x8x1xf32>
    %47 = vector.broadcast %46 : vector<4x8x1xf32> to vector<4x8x8xf32>
    %48 = arith.subf %44, %47 : vector<4x8x8xf32>
    %49 = math.exp %48 : vector<4x8x8xf32>
    %cst_18 = arith.constant dense<0.000000e+00> : vector<4x8xf32>
    %50 = vector.multi_reduction <add>, %49, %cst_18 [2] : vector<4x8x8xf32> to vector<4x8xf32>
    %51 = vector.shape_cast %50 : vector<4x8xf32> to vector<4x8x1xf32>
    %52 = tpu.reciprocal %51 {approx = true} : vector<4x8x1xf32> -> vector<4x8x1xf32>
    %53 = vector.broadcast %52 : vector<4x8x1xf32> to vector<4x8x8xf32>
    %54 = arith.mulf %49, %53 : vector<4x8x8xf32>
    %55 = arith.truncf %54 : vector<4x8x8xf32> to vector<4x8x8xbf16>
    %56 = arith.truncf %14 : vector<4x8x8xf32> to vector<4x8x8xbf16>
    "tpu.trace_start"() <{level = 10 : i32, message = "hqk,hkd->hqd"}> : () -> ()
    %cst_19 = arith.constant dense<0.000000e+00> : vector<4x8x8xf32>
    %57 = tpu.matmul %55, %56, %cst_19 {dimension_numbers = #tpu.dot_dimension_numbers<[2], [1], [1], [2], [0, 0, 0, 1, 1, 2], [0], [0]>} : vector<4x8x8xbf16>, vector<4x8x8xbf16>, vector<4x8x8xf32> -> vector<4x8x8xf32>
    "tpu.trace_stop"() : () -> ()
    %58 = tpu.transpose %57, [1, 0, 2] : vector<4x8x8xf32> -> vector<8x4x8xf32>
    %59 = vector.shape_cast %58 : vector<8x4x8xf32> to vector<8x32xf32>
    %60 = arith.truncf %59 : vector<8x32xf32> to vector<8x32xbf16>
    %c0_20 = arith.constant 0 : index
    %c0_21 = arith.constant 0 : index
    %61 = vector.load %arg5[%c0_20, %c0_21] : memref<32x32xbf16, #tpu.memory_space<vmem>>, vector<32x32xbf16>
    %cst_22 = arith.constant dense<0.000000e+00> : vector<8x32xf32>
    %62 = tpu.matmul %60, %61, %cst_22 {dimension_numbers = #tpu.dot_dimension_numbers<[1], [0], [0], [1], [0, 0, 1, 1], [], []>} : vector<8x32xbf16>, vector<32x32xbf16>, vector<8x32xf32> -> vector<8x32xf32>
    %63 = vector.shape_cast %62 : vector<8x32xf32> to vector<1x8x32xf32>
    %c0_23 = arith.constant 0 : index
    %c0_24 = arith.constant 0 : index
    %c0_25 = arith.constant 0 : index
    %64 = vector.load %arg8[%c0_23, %c0_24, %c0_25] : memref<1x8x32xf32, #tpu.memory_space<vmem>>, vector<1x8x32xf32>
    tpu.vector_store %arg8[%c0_23, %c0_24, %c0_25], %63 {strides = array<i32>} : memref<1x8x32xf32, #tpu.memory_space<vmem>>, vector<1x8x32xf32>,
    return
  }
  func.func @transform_0(%arg0: i32) -> (i32, i32, i32) {
    %c0_i32 = arith.constant 0 : i32
    %c0_i32_0 = arith.constant 0 : i32
    %c0_i32_1 = arith.constant 0 : i32
    return %arg0, %c0_i32, %c0_i32_0 : i32, i32, i32
  }
  func.func @transform_1(%arg0: i32) -> (i32, i32) {
    %c0_i32 = arith.constant 0 : i32
    %c0_i32_0 = arith.constant 0 : i32
    %c0_i32_1 = arith.constant 0 : i32
    return %c0_i32, %c0_i32_0 : i32, i32
  }
  func.func @transform_2(%arg0: i32) -> (i32, i32) {
    %c0_i32 = arith.constant 0 : i32
    %c0_i32_0 = arith.constant 0 : i32
    %c0_i32_1 = arith.constant 0 : i32
    return %c0_i32, %c0_i32_0 : i32, i32
  }
  func.func @transform_3(%arg0: i32) -> (i32, i32) {
    %c0_i32 = arith.constant 0 : i32
    %c0_i32_0 = arith.constant 0 : i32
    %c0_i32_1 = arith.constant 0 : i32
    return %c0_i32, %c0_i32_0 : i32, i32
  }
  func.func @transform_4(%arg0: i32) -> (i32, i32) {
    %c0_i32 = arith.constant 0 : i32
    %c0_i32_0 = arith.constant 0 : i32
    %c0_i32_1 = arith.constant 0 : i32
    return %c0_i32, %c0_i32_0 : i32, i32
  }
  func.func @transform_5(%arg0: i32) -> (i32, i32) {
    %c0_i32 = arith.constant 0 : i32
    %c0_i32_0 = arith.constant 0 : i32
    %c0_i32_1 = arith.constant 0 : i32
    return %c0_i32, %c0_i32_0 : i32, i32
  }
  func.func @transform_6(%arg0: i32) -> (i32, i32) {
    %c0_i32 = arith.constant 0 : i32
    %c0_i32_0 = arith.constant 0 : i32
    %c0_i32_1 = arith.constant 0 : i32
    return %c0_i32, %c0_i32_0 : i32, i32
  }
  func.func @transform_7(%arg0: i32) -> (i32, i32, i32) {
    %c0_i32 = arith.constant 0 : i32
    %c0_i32_0 = arith.constant 0 : i32
    %c0_i32_1 = arith.constant 0 : i32
    return %arg0, %c0_i32, %c0_i32_0 : i32, i32, i32
  }
}

</mosaic_0001>

<bundles_post_ra>
// kernel: tpu_custom_call.1
= control target key start
LH: loop header
LB: loop body
LE: loop exit
PB: predicated region body
PF: predicated region fallthrough
CT: control target
= control target key end

     0   :  { %s2933_s0 = inlined_call_operand.hbm [shape: f32[2,8,32], index: 0, kind: input, shape index: {}]   ;;  %s2934_s1 = inlined_call_operand.hbm [shape: bf16[32,32], index: 1, kind: input, shape index: {}]   ;;  %s2935_s2 = inlined_call_operand.hbm [shape: bf16[32,32], index: 2, kind: input, shape index: {}]   ;;  %s2936_s3 = inlined_call_operand.hbm [shape: bf16[32,32], index: 3, kind: input, shape index: {}]   ;;  %s2937_s4 = inlined_call_operand.hbm [shape: bf16[32,32], index: 4, kind: input, shape index: {}]   ;;  %s2938_s5 = inlined_call_operand.vmem [shape: f32[8,8], index: 5, kind: input, shape index: {}]   ;;  %s2939_s6 = inlined_call_operand.hbm [shape: f32[8,8], index: 6, kind: input, shape index: {}]   ;;  %s2940_s7 = inlined_call_operand.hbm [shape: f32[2,8,32], index: 7, kind: output, shape index: {}]  }
   0x1   :  { %2945 = sst [smem:[#allocation19_spill]] %s2934_s1 }
   0x2   :  { %2946 = sst [smem:[#allocation20_spill]] %s2935_s2 }
   0x3   :  { %12 = vsyncpa [#allocation3], 0 }
   0x4   :  { %14 = vsyncpa [#allocation3 + $0x1], 0 }
   0x5   :  { %15 = vsyncpa [#allocation6], 0 }
   0x6   :  { %16 = vsyncpa [#allocation9], 0 }
   0x7   :  { %17 = vsyncpa [#allocation12], 0 }
   0x8   :  { %18 = vsyncpa [#allocation4], 0 }
   0x9   :  { %20 = vsyncpa [#allocation4 + $0x1], 0  ;;  %s2448_s24 = smov 0   ;;  %s2450_s25 = smov 0  }
   0xa   :  { %s2452_s26 = smov 0   ;;  %s2454_s27 = smov 0  }
   0xb LB: > { %s2387_s28 = smov [#allocation5]   ;;  %s2469_s30 = sadd.s32 4294967295, %s2385_s27   ;;  %s2385_s27 = sphi %s2454_s27, %s2970_s27   ;;  %s2381_s26 = sphi %s2452_s26, %s2969_s26   ;;  %s2377_s25 = sphi %s2450_s25, %s2968_s25   ;;  %s2373_s24 = sphi %s2448_s24, %s2967_s24  }
   0xc   : > { %s221_s29 = sshll.u32 %s2387_s28, 4  ;;  %p1859_p0 = scmp.ge.s32.totalorder %s2385_s27, 1  ;;  %s222_s29 = int_to_ptr.vmem [resolvable:$true] %s221_s29 }
   0xd   : > { %p2941_p1 = scmp.eq.s32.totalorder %s2469_s30, 0  ;;  %p209_p2 = scmp.lt.s32.totalorder %s2385_s27, 3 }
   0xe   : > { %s2388_s9 = smov [#allocation8]   ;;  %s2389_s12 = smov [#allocation7]  }
   0xf   : > { %p2474_p3 = pnand %p1859_p0, %p209_p2  ;;  %s247_s10 = sshll.u32 %s2388_s9, 4  ;;  %s2487_s10 = int_to_ptr.vmem [resolvable:$true] %s247_s10 }
  0x10   : > { %s234_s13 = sshll.u32 %s2389_s12, 4  ;;  %s2162_s15 = scalar_lea.vmem %s222_s29, 256  ;;  %s2489_s13 = int_to_ptr.vmem [resolvable:$true] %s234_s13 }
  0x11   : > { %s2947_s8 = scalar_select %p2474_p3, 1, 0 }
  0x12   : > { %p2040_p5 = pneg %p2474_p3  ;;  %p2163_p8 = scmp.ne.s32.totalorder %s222_s29, %s2162_s15 }
  0x13   : > { %p2170_p11 = scmp.lt.s32.totalorder %s222_s29, %s222_s29  ;;  %p2171_p12 = scmp.lt.s32.totalorder %s2162_s15, %s2162_s15 }
  0x14   : > { %p2483_p6 = pnand %p2040_p5, %p2941_p1 }
  0x15   : > { %p2172_p13 = por %p2171_p12, %p2170_p11 }
  0x16   : > { %p2493_p7 = pneg %p2483_p6 }
  0x18   : > { %p2165_p9 = pnand %p2163_p8, %p2493_p7 }
  0x1a   : > { %p2166_p10 = pneg %p2165_p9 }
  0x1c   : > { %p2173_p0 = pnand %p2172_p13, %p2166_p10 }
  0x1e   : > { %2176 = shalt.err (!%p2173_p0)
}
  0x1f   : > { %s2390_s16 = smov 64   ;;  %s2391_s17 = smov 4  }
  0x20   : > { %s2950_s1 = sld [smem:[#allocation19_spill]]  ;;  %s2188_s20 = scalar_lea.vmem %s2487_s10, 256 }
  0x21   : > { %p2189_p2 = scmp.ne.s32.totalorder %s2487_s10, %s2188_s20  ;;  %p2196_p9 = scmp.lt.s32.totalorder %s2487_s10, %s2487_s10 }
  0x22   : > { %p2197_p10 = scmp.lt.s32.totalorder %s2188_s20, %s2188_s20 }
  0x23   : > { %p2191_p5 = pnand %p2189_p2, %p2493_p7 }
  0x24   : > { %p2198_p11 = por %p2197_p10, %p2196_p9 }
  0x25   : > { %p2192_p8 = pneg %p2191_p5 }
  0x26   : > { %2043 = dma.hbm_to_vmem [thread:$0]  (!%p2483_p6), %s2950_s1, 256, %s222_s29, [#allocation6], %s2390_s16, %s2390_s16, %s2391_s17  }
  0x27   : > { %p2199_p12 = pnand %p2198_p11, %p2192_p8 }
  0x29   : > { %2202 = shalt.err (!%p2199_p12)
}
  0x2a   : > { %2049 = dma.hbm_to_vmem [thread:$0]  (!%p2483_p6), %s2936_s3, 256, %s2487_s10, [#allocation9], %s2390_s16, %s2390_s16, %s2391_s17  }
  0x2b   : > { %s2214_s23 = scalar_lea.vmem %s2489_s13, 256  ;;  %p2222_p5 = scmp.lt.s32.totalorder %s2489_s13, %s2489_s13 }
  0x2c   : > { %p2215_p13 = scmp.ne.s32.totalorder %s2489_s13, %s2214_s23  ;;  %p2223_p8 = scmp.lt.s32.totalorder %s2214_s23, %s2214_s23 }
  0x2e   : > { %p2217_p0 = pnand %p2215_p13, %p2493_p7  ;;  %p2224_p9 = por %p2223_p8, %p2222_p5 }
  0x30   : > { %p2218_p2 = pneg %p2217_p0 }
  0x32   : > { %p2225_p10 = pnand %p2224_p9, %p2218_p2 }
  0x34   : > { %2228 = shalt.err (!%p2225_p10)
}
  0x35   : > { %s2951_s2 = sld [smem:[#allocation20_spill]]  ;;  %s2392_s9 = smov [#allocation10]  }
  0x36   : > { %s260_s10 = sshll.u32 %s2392_s9, 4  ;;  %s2393_s12 = smov [#allocation11]   ;;  %s261_s10 = int_to_ptr.vmem [resolvable:$true] %s260_s10 }
  0x37   : > { %s277_s15 = sshll.u32 %s2393_s12, 4  ;;  %s2240_s18 = scalar_lea.vmem %s261_s10, 256  ;;  %s278_s15 = int_to_ptr.vmem [resolvable:$true] %s277_s15 }
  0x38   : > { %p2241_p11 = scmp.ne.s32.totalorder %s261_s10, %s2240_s18  ;;  %p2248_p0 = scmp.lt.s32.totalorder %s261_s10, %s261_s10 }
  0x39   : > { %p2249_p2 = scmp.lt.s32.totalorder %s2240_s18, %s2240_s18 }
  0x3a   : > { %p2243_p12 = pnand %p2241_p11, %p2493_p7 }
  0x3b   : > { %2046 = dma.hbm_to_vmem [thread:$0]  (!%p2483_p6), %s2951_s2, 256, %s2489_s13, [#allocation6], %s2390_s16, %s2390_s16, %s2391_s17  }
  0x3c   : > { %p2244_p13 = pneg %p2243_p12  ;;  %p2250_p5 = por %p2249_p2, %p2248_p0 }
  0x3e   : > { %p2251_p8 = pnand %p2250_p5, %p2244_p13 }
  0x40   : > { %2254 = shalt.err (!%p2251_p8)
}
  0x41   : > { %2052 = dma.hbm_to_vmem [thread:$0]  (!%p2483_p6), %s2937_s4, 256, %s261_s10, [#allocation9], %s2390_s16, %s2390_s16, %s2391_s17  }
  0x42   : > { %s2266_s20 = scalar_lea.vmem %s278_s15, 128  ;;  %p2274_p12 = scmp.lt.s32.totalorder %s278_s15, %s278_s15 }
  0x43   : > { %p2267_p9 = scmp.ne.s32.totalorder %s278_s15, %s2266_s20  ;;  %p2275_p0 = scmp.lt.s32.totalorder %s2266_s20, %s2266_s20 }
  0x45   : > { %p2269_p10 = pnand %p2267_p9, %p2493_p7  ;;  %p2276_p13 = por %p2275_p0, %p2274_p12 }
  0x47   : > { %p2270_p11 = pneg %p2269_p10 }
  0x49   : > { %p2277_p2 = pnand %p2276_p13, %p2270_p11 }
  0x4b   : > { %2280 = shalt.err (!%p2277_p2)
}
  0x4c   : > { %2055 = dma.hbm_to_vmem [thread:$0]  (!%p2483_p6), %s2939_s6, 128, %s278_s15, [#allocation12]  }
  0x4d   : > { %s1858_s14 = sadd.s32 4294967294, %s2385_s27   ;;  %s2556_s11 = sadd.s32 1, %s2385_s27  }
  0x4e   : > { %s33_s16 = sadd.s32 1, %s2381_s26  ;;  %s30_s17 = ssub.s32 %s2385_s27, %s2556_s11 }
  0x4f   : > { %p40_p7 = scmp.ne.s32.totalorder %s2381_s26, %s2377_s25  ;;  %p31_p5 = scmp.eq.s32.totalorder %s30_s17, 0 }
  0x50   : > { %p41_p8 = scmp.eq.s32.totalorder %s2385_s27, 0  ;;  %p46_p9 = scmp.ne.s32.totalorder %s2377_s25, %s2373_s24 }
  0x51   : > { %p196_p10 = scmp.eq.s32.totalorder %s2469_s30, 1  ;;  %p202_p0 = scmp.eq.s32.totalorder %s1858_s14, 1 }
  0x52   : > { %s2568_s23 = scalar_select %p31_p5, %s2381_s26, %s33_s16  }
  0x53   : > { %p42_p11 = por %p41_p8, %p40_p7  ;;  %p2572_p12 = por %p2941_p1, %p46_p9 }
  0x54   : > { %p2576_p6 = por %p196_p10, %p40_p7  ;;  %p2069_p13 = scmp.lt.s32.totalorder %s2385_s27, 2 }
  0x55   : > { %s2952_s28 = scalar_select %p2572_p12, 1, 0 }
  0x56   : > { %s2953_s29 = scalar_select %p2576_p6, 1, 0 }
  0x57   : > { %s288_s9 = sand.u32 1, %s2381_s26   ;;  %p2582_p2 = por %p202_p0, %p46_p9 }
  0x58   : > { %s1866_s12 = sshll.u32 %s288_s9, 3  ;;  %s1867_s15 = sshll.u32 %s2385_s27, 7 }
  0x59   : > { %s2954_s10 = scalar_select %p2582_p2, 1, 0 }
  0x5a   : > { %s2590_s19 = scalar_lea.hbm %s2933_s0, %s1867_s15  ;;  %s292_s20 = scalar_lea.vmem [#allocation2], %s1866_s12 }
  0x5b   : > { %s299_s21 = sshll.u32 %s292_s20, 4  ;;  %p2592_p7 = pnand %p2069_p13, %p42_p11  ;;  %s300_s21 = int_to_ptr.vmem [resolvable:$true] %s299_s21 }
  0x5c   : > { %s289_s14 = scalar_lea.sflag [#allocation3], %s288_s9  ;;  %s2281_s16 = scalar_lea.hbm %s2590_s19, 128 }
  0x5d   : > { %p2282_p5 = scmp.ne.s32.totalorder %s2590_s19, %s2281_s16  ;;  %p2283_p8 = pneg %p2592_p7 }
  0x5e   : > { %s2286_s18 = scalar_lea.hbm %s2933_s0, 256  ;;  %p2287_p11 = scmp.lt.s32.totalorder %s2590_s19, %s2933_s0 }
  0x5f   : > { %p2284_p9 = pnand %p2283_p8, %p2282_p5  ;;  %p2288_p0 = scmp.lt.s32.totalorder %s2286_s18, %s2281_s16 }
  0x61   : > { %p2285_p10 = pneg %p2284_p9  ;;  %p2289_p13 = por %p2288_p0, %p2287_p11 }
  0x63   : > { %p2290_p4 = pnand %p2289_p13, %p2285_p10 }
  0x65   : > { %2293 = shalt.err (!%p2290_p4)
}
  0x66   : > { %s2294_s20 = scalar_lea.vmem %s300_s21, 128  ;;  %s2394_s9 = smov [#allocation2]  }
  0x67   : > { %p2295_p1 = scmp.ne.s32.totalorder %s300_s21, %s2294_s20  ;;  %s2299_s1 = sshll.u32 %s2394_s9, 4  ;;  %s2300_s1 = int_to_ptr.vmem [resolvable:$false] %s2299_s1 }
  0x68   : > { %s2301_s2 = scalar_lea.vmem %s2300_s1, 256  ;;  %p2302_p5 = scmp.lt.s32.totalorder %s300_s21, %s2300_s1 }
  0x69   : > { %p2297_p2 = pnand %p2295_p1, %p2283_p8  ;;  %p2303_p9 = scmp.lt.s32.totalorder %s2301_s2, %s2294_s20 }
  0x6b   : > { %p2298_p6 = pneg %p2297_p2  ;;  %p2304_p12 = por %p2303_p9, %p2302_p5 }
  0x6d   : > { %p2305_p3 = pnand %p2304_p12, %p2298_p6 }
  0x6f   : > { %2308 = shalt.err (!%p2305_p3)
}
  0x70   : > { %2059 = dma.hbm_to_vmem [thread:$0]  (!%p2592_p7), %s2590_s19, 128, %s300_s21, %s289_s14  }
  0x71   : > { %p2956_p10 = scmp.ne.s32.totalorder %s2947_s8, 0 }
  0x72   : > { %s2613_s16 = sand.u32 (!%p2956_p10), 1, %s2377_s25   ;;  %p2957_p1 = scmp.ne.s32.totalorder (!%p2956_p10), %s2952_s28, 0 }
  0x73   : > { %308 = sbr.rel (%p2956_p10) target bundleno = 1710 (0x6ae), region = 48  ;;  %s1869_s17 = sshll.u32 (!%p2956_p10), %s2613_s16, 3 }
  0x74   : > { %s311_s1 = scalar_lea.sflag (!%p2956_p10), [#allocation3], %s2613_s16  ;;  %s314_s2 = scalar_lea.vmem (!%p2956_p10), [#allocation2], %s1869_s17 }
  0x78   : > { %2352 = dma.done.wait (%p2957_p1), %s311_s1, 128  }
  0x79   : > { %2354 = vsyncadd (%p2957_p1), %s311_s1, 4294967168  ;;  %p2958_p3 = scmp.eq.s32.totalorder %s2469_s30, 0 }
  0x7b   : > { %2356 = dma.done.wait (%p2958_p3), [#allocation6], 512   ;;  %p2959_p4 = pmov %p2958_p3 }
  0x7c   : > { %p2960_p12 = pmov %p2958_p3 }
  0x7d   : > { %2358 = vsyncadd (%p2959_p4), [#allocation6], 4294966784 }
  0x7e   : > { %2360 = dma.done.wait (%p2960_p12), [#allocation9], 512   ;;  %p2961_p6 = pmov %p2958_p3 }
  0x7f   : > { %p2962_p2 = pmov %p2958_p3 }
  0x80   : > { %2362 = vsyncadd (%p2961_p6), [#allocation9], 4294966784 }
  0x81   : > { %2364 = dma.done.wait (%p2962_p2), [#allocation12], 128   ;;  %p2963_p7 = pmov %p2962_p2 }
  0x82   : > { %v2395_v0 = vmov 0.0   ;;  %vm2396_vm0 = vmmov 0   ;;  %v2127_v1 = vld [vmem:[#allocation7 + $0x8] sm:$0xff]   ;;  %v2128_v2 = vld [vmem:[#allocation5 + $0x8] sm:$0xff]   ;;  %v2129_v3 = vld [vmem:[#allocation7] sm:$0xff]   ;;  %vm384_vm1 = vcmask 261120   ;;  %v555_v18 = vlaneseq }
  0x83   : > { %2366 = vsyncadd (%p2963_p7), [#allocation12], 4294967168  ;;  %1944 = vmatprep.subr.bf16.mxu1 %v2395_v0  ;;  %1936 = vmatprep.subr.bf16.mxu0 %v2395_v0  ;;  %v2130_v4 = vld [vmem:[#allocation5] sm:$0xff]   ;;  %v366_v5 = vld [vmem:[%s314_s2] sm:$0xff]  ;;  %s2397_s8 = smov 104   ;;  %s2398_s28 = smov 120  }
  0x84   : > { %1948 = vmatprep.mubr.msk.bf16.mxu1 %vm2396_vm0, %v2395_v0  ;;  %1940 = vmatprep.mubr.msk.bf16.mxu0 %vm2396_vm0, %v2395_v0  ;;  %v2643_v6 = vpack.c.bf16 %v366_v5, %v366_v5  ;;  %s2399_s19 = smov 112   ;;  %v2131_v15 = vld [vmem:[#allocation8 + $0x8] sm:$0xff]   ;;  %v2400_v16 = vmov 1983009808   ;;  %v2401_v19 = vmov 1934713408  }
  0x85   : > { %1945 = vmatpush3.bf16.msra.mxu1 %v2127_v1  ;;  %1937 = vmatpush3.bf16.msra.mxu0 %v2128_v2  ;;  %v553_v17 = vunpack.c.l.s4 %v2400_v16  ;;  %v585_v20 = vunpack.c.l.s4 %v2401_v19  ;;  %v2663_v22 = vshrl.u32 %v555_v18, 7  ;;  %v2132_v44 = vld [vmem:[#allocation8] sm:$0xff]   ;;  %s2402_s21 = smov 124   ;;  %s2403_s22 = smov 4   ;;  %vm1008_vm2 = vcmask 31744  }
  0x86   : > { %1946 = vmatprep.subr.bf16.mxu1 %v2395_v0  ;;  %1938 = vmatprep.subr.bf16.mxu0 %v2395_v0  ;;  %vm1077_vm3 = vcmask 64512   ;;  %vm1330_vm5 = vcmask 1043456   ;;  %s2404_s18 = smov 16   ;;  %s2405_s13 = smov 8   ;;  %vm1661_vm6 = vcmask 130048   ;;  %vm1663_vm7 = vcmask 195584  }
  0x87   : > { %v554_v21 = vunpack.c.0.s8 %v553_v17  ;;  %v586_v25 = vunpack.c.0.s8 %v585_v20  ;;  %s2406_s12 = smov 24   ;;  %s1905_s20 = sshll.u32 %s2469_s30, 7 }
  0x88   : > { %s364_s9 = scalar_lea.vmem [#allocation13], %s1869_s17  ;;  %p2964_p11 = scmp.ne.s32.totalorder %s2953_s29, 0 }
  0x89   : > { %1947 = vmatpush3.bf16.msra.mxu1 %v2129_v3  ;;  %1939 = vmatpush3.bf16.msra.mxu0 %v2130_v4  ;;  %v2666_v26 = vsub.s32 %v554_v21, %v2663_v22  ;;  %v2669_v33 = vsub.s32 %v586_v25, %v2663_v22  ;;  %s1740_s1 = sshll.u32 %s364_s9, 4  ;;  %s2407_s30 = smov [#allocation13]   ;;  %s2891_s1 = int_to_ptr.vmem [resolvable:$true] %s1740_s1 }
  0x8a   : > { %1960 = vmatprep.subr.bf16.mxu1 %v2395_v0  ;;  %1952 = vmatprep.subr.bf16.mxu0 %v2395_v0  ;;  %s2313_s17 = sshll.u32 %s2407_s30, 4  ;;  %s2314_s17 = int_to_ptr.vmem [resolvable:$false] %s2313_s17 }
  0x8b   : > { %p2316_p5 = scmp.lt.s32.totalorder %s2891_s1, %s2314_s17 }
  0x8c   : > { %1949 = vmatmul.mubr.msk.bf16.vlgmr.msra.gmra.mxu1 %vm384_vm1, %v2643_v6  ;;  %1941 = vmatmul.mubr.msk.bf16.vlgmr.msra.gmra.mxu0 %vm384_vm1, %v2643_v6 }
  0x8d   : > { %1962 = vmatprep.mubr.msk.bf16.mxu1 %vm2396_vm0, %v2395_v0  ;;  %1956 = vmatprep.mubr.msk.bf16.mxu0 %vm2396_vm0, %v2395_v0 }
  0x8e   : > { %1953 = vmatpush3.bf16.msra.mxu0 %v2131_v15 }
  0x8f   : > { %1954 = vmatprep.subr.bf16.mxu0 %v2395_v0 }
  0x92   : > { %1955 = vmatpush3.bf16.msra.mxu0 %v2132_v44 }
  0x93   : > { %1966 = vmatprep.subr.bf16.mxu0 %v2395_v0 }
  0x95   : > { %1957 = vmatmul.mubr.msk.bf16.vlgmr.msra.gmra.mxu0 %vm384_vm1, %v2643_v6 }
  0x96   : > { %1968 = vmatprep.mubr.msk.bf16.mxu0 %vm2396_vm0, %v2395_v0 }
 0x14c   : > { %v478_v7 = vpop.f32.mrf.mxu1  ;;  %v422_v8 = vpop.f32.mrf.mxu0 }
 0x14d   : > { %693 = vrot.lane.b32.xlu1 %v478_v7, %s2397_s8  ;;  %687 = vrot.lane.b32.xlu0 %v478_v7, %s2398_s28 }
 0x14e   : > { %v1950_v9 = vpop.f32.mrf.mxu1  ;;  %v1942_v10 = vpop.f32.mrf.mxu0 }
 0x150   : > { %v481_v11 = vpop.f32.mrf.mxu1  ;;  %v425_v12 = vpop.f32.mrf.mxu0 }
 0x151   : > { %690 = vrot.lane.b32.xlu0 %v478_v7, %s2399_s19  ;;  %541 = vrot.lane.b32.xlu1 %v422_v8, %s2398_s28 }
 0x152   : > { %v1951_v13 = vpop.f32.mrf.mxu1  ;;  %v1943_v14 = vpop.f32.mrf.mxu0 }
 0x155   : > { %544 = vrot.lane.b32.xlu0 %v422_v8, %s2399_s19  ;;  %547 = vrot.lane.b32.xlu1 %v422_v8, %s2397_s8 }
 0x1bf   : > { %v694_v23 = vpop.permute.xlu1 %693  ;;  %v688_v24 = vpop.permute.xlu0 %687 }
 0x1c0   : > { %v712_v27 = vcombine.low %v688_v24, %v694_v23  ;;  %v713_v28 = vcombine.high %v688_v24, %v694_v23 }
 0x1c2   : > { %v720_v34 = vrot.slane %v712_v27, %v2666_v26  ;;  %v727_v35 = vrot.slane %v713_v28, %v2666_v26 }
 0x1c3   : > { %v691_v29 = vpop.permute.xlu0 %690  ;;  %v542_v30 = vpop.permute.xlu1 %541 }
 0x1c4   : > { %v696_v31 = vcombine.low %v478_v7, %v691_v29  ;;  %v697_v32 = vcombine.high %v478_v7, %v691_v29 }
 0x1c6   : > { %v704_v36 = vrot.slane %v696_v31, %v2666_v26  ;;  %v711_v37 = vrot.slane %v697_v32, %v2666_v26 }
 0x1c7   : > { %v545_v38 = vpop.permute.xlu0 %544  ;;  %v548_v39 = vpop.permute.xlu1 %547 }
 0x1c8   : > { %v728_v40 = vcombine.low %v704_v36, %v720_v34  ;;  %v729_v41 = vcombine.high %v704_v36, %v720_v34  ;;  %v744_v42 = vcombine.low %v711_v37, %v727_v35  ;;  %v745_v43 = vcombine.high %v711_v37, %v727_v35 }
 0x1c9   : > { %v550_v45 = vcombine.low %v422_v8, %v545_v38  ;;  %v551_v46 = vcombine.high %v422_v8, %v545_v38  ;;  %v566_v47 = vcombine.low %v542_v30, %v548_v39  ;;  %v567_v48 = vcombine.high %v542_v30, %v548_v39 }
 0x1ca   : > { %v736_v49 = vrot.slane %v728_v40, %v2669_v33  ;;  %v743_v50 = vrot.slane %v729_v41, %v2669_v33  ;;  %v752_v51 = vrot.slane %v744_v42, %v2669_v33  ;;  %v759_v52 = vrot.slane %v745_v43, %v2669_v33 }
 0x1cb   : > { %v558_v53 = vrot.slane %v550_v45, %v2666_v26  ;;  %v565_v54 = vrot.slane %v551_v46, %v2666_v26  ;;  %v574_v55 = vrot.slane %v566_v47, %v2666_v26  ;;  %v581_v56 = vrot.slane %v567_v48, %v2666_v26  ;;  %v2735_v48 = vld [vmem:[%s2938_s5] sm:$0xff] }
 0x1cc   : > { %v764_v57 = vcombine.low %v736_v49, %v743_v50  ;;  %v1887_v58 = vcombine.high %v736_v49, %v743_v50  ;;  %v780_v59 = vcombine.low %v752_v51, %v759_v52  ;;  %v1888_v60 = vcombine.high %v752_v51, %v759_v52  ;;  %v2737_v49 = vld [vmem:[#allocation11] sm:$0xff] }
 0x1cd   : > { %v582_v61 = vcombine.low %v558_v53, %v574_v55  ;;  %v583_v62 = vcombine.high %v558_v53, %v574_v55  ;;  %v598_v63 = vcombine.low %v565_v54, %v581_v56  ;;  %v599_v1 = vcombine.high %v565_v54, %v581_v56 }
 0x1ce   : > { %v771_v2 = vrot.slane %v764_v57, %v2666_v26  ;;  %v779_v3 = vrot.slane %v1887_v58, %v2666_v26  ;;  %v787_v4 = vrot.slane %v780_v59, %v2666_v26  ;;  %v795_v5 = vrot.slane %v1888_v60, %v2666_v26 }
 0x1cf   : > { %v590_v7 = vrot.slane %v582_v61, %v2669_v33  ;;  %v597_v8 = vrot.slane %v583_v62, %v2669_v33  ;;  %v606_v9 = vrot.slane %v598_v63, %v2669_v33  ;;  %v613_v10 = vrot.slane %v599_v1, %v2669_v33 }
 0x1d0   : > { %v796_v6 = vcombine.low %v771_v2, %v779_v3  ;;  %v812_v11 = vcombine.low %v787_v4, %v795_v5  ;;  %v797_v34 = vcombine.high %v771_v2, %v779_v3  ;;  %v813_v35 = vcombine.high %v787_v4, %v795_v5 }
 0x1d1   : > { %v618_v12 = vcombine.low %v590_v7, %v597_v8  ;;  %v1885_v13 = vcombine.high %v590_v7, %v597_v8  ;;  %v634_v14 = vcombine.low %v606_v9, %v613_v10  ;;  %v1886_v15 = vcombine.high %v606_v9, %v613_v10 }
 0x1d2   : > { %v804_v16 = vrot.slane %v796_v6, %v2669_v33  ;;  %v820_v17 = vrot.slane %v812_v11, %v2669_v33  ;;  %v811_v36 = vrot.slane %v797_v34, %v2669_v33  ;;  %v827_v37 = vrot.slane %v813_v35, %v2669_v33 }
 0x1d3   : > { %v625_v19 = vrot.slane %v618_v12, %v2666_v26  ;;  %v633_v20 = vrot.slane %v1885_v13, %v2666_v26  ;;  %v641_v21 = vrot.slane %v634_v14, %v2666_v26  ;;  %v649_v23 = vrot.slane %v1886_v15, %v2666_v26 }
 0x1d4   : > { %v828_v24 = vcombine.low %v804_v16, %v820_v17  ;;  %v829_v25 = vcombine.high %v804_v16, %v820_v17  ;;  %v2710_v38 = vcombine.high %v811_v36, %v827_v37  ;;  %v2712_v39 = vcombine.low %v811_v36, %v827_v37 }
 0x1d5   : > { %v650_v27 = vcombine.low %v625_v19, %v633_v20  ;;  %v666_v28 = vcombine.low %v641_v21, %v649_v23  ;;  %v651_v40 = vcombine.high %v625_v19, %v633_v20  ;;  %v667_v41 = vcombine.high %v641_v21, %v649_v23 }
 0x1d6   : > { %1029 = vrot.lane.b32.xlu0 %v828_v24, %s2402_s21  ;;  %1031 = vrot.lane.b32.xlu1 %v829_v25, %s2402_s21  ;;  %v1057_v54 = vmul.f32 %v2735_v48, %v828_v24  ;;  %v1058_v56 = vmul.f32 %v2735_v48, %v829_v25  ;;  %v1059_v23 = vmul.f32 %v2735_v48, %v2712_v39 }
 0x1d7   : > { %v658_v29 = vrot.slane %v650_v27, %v2669_v33  ;;  %v674_v30 = vrot.slane %v666_v28, %v2669_v33  ;;  %v665_v42 = vrot.slane %v651_v40, %v2669_v33  ;;  %v681_v43 = vrot.slane %v667_v41, %v2669_v33 }
 0x1d9   : > { %v683_v31 = vcombine.high %v658_v29, %v674_v30  ;;  %v682_v32 = vcombine.low %v658_v29, %v674_v30  ;;  %v2722_v44 = vcombine.high %v665_v42, %v681_v43  ;;  %v2724_v45 = vcombine.low %v665_v42, %v681_v43 }
 0x1da   : > { %1041 = vrot.lane.b32.xlu0 %v828_v24, %s2403_s22  ;;  %1043 = vrot.lane.b32.xlu1 %v829_v25, %s2403_s22  ;;  %v1060_v25 = vmul.f32 %v2735_v48, %v2710_v38 }
 0x1db   : > { %v1013_v7 = vmul.f32 %v2735_v48, %v682_v32  ;;  %v1014_v10 = vmul.f32 %v2735_v48, %v683_v31  ;;  %v1016_v43 = vmul.f32 %v2735_v48, %v2722_v44 }
 0x1de   : > { %986 = vrot.lane.b32.xlu1 %v683_v31, %s2402_s21  ;;  %984 = vrot.lane.b32.xlu0 %v682_v32, %s2402_s21 }
 0x1e2   : > { %998 = vrot.lane.b32.xlu1 %v683_v31, %s2403_s22  ;;  %996 = vrot.lane.b32.xlu0 %v682_v32, %s2403_s22 }
 0x1e6   : > { %1035 = vrot.lane.b32.xlu1 %v2710_v38, %s2402_s21  ;;  %1033 = vrot.lane.b32.xlu0 %v2712_v39, %s2402_s21 }
 0x1ea   : > { %1047 = vrot.lane.b32.xlu1 %v2710_v38, %s2403_s22  ;;  %1045 = vrot.lane.b32.xlu0 %v2712_v39, %s2403_s22  ;;  %v1015_v39 = vmul.f32 %v2735_v48, %v2724_v45 }
 0x1ee   : > { %990 = vrot.lane.b32.xlu1 %v2722_v44, %s2402_s21  ;;  %988 = vrot.lane.b32.xlu0 %v2724_v45, %s2402_s21  ;;  %s2309_s21 = scalar_lea.vmem %s2891_s1, 128 }
 0x1ef   : > { %p2310_p8 = scmp.ne.s32.totalorder %s2891_s1, %s2309_s21 }
 0x1f1   : > { %p2311_p0 = pnand %p2310_p8, %p2964_p11 }
 0x1f2   : > { %1002 = vrot.lane.b32.xlu1 %v2722_v44, %s2403_s22  ;;  %1000 = vrot.lane.b32.xlu0 %v2724_v45, %s2403_s22  ;;  %v2787_v44 = vpop.f32.mrf.mxu0  ;;  %s2315_s22 = scalar_lea.vmem %s2314_s17, 256 }
 0x1f3   : > { %p2312_p13 = pneg %p2311_p0  ;;  %p2317_p9 = scmp.lt.s32.totalorder %s2315_s22, %s2309_s21 }
 0x1f4   : > { %v1958_v48 = vpop.f32.mrf.mxu0 }
 0x1f5   : > { %p2318_p10 = por %p2317_p9, %p2316_p5 }
 0x1f7   : > { %p2319_p1 = pnand %p2318_p10, %p2312_p13 }
 0x248   : > { %v1030_v46 = vpop.permute.xlu0 %1029  ;;  %v1032_v47 = vpop.permute.xlu1 %1031 }
 0x24c   : > { %v1042_v50 = vpop.permute.xlu0 %1041  ;;  %v1044_v51 = vpop.permute.xlu1 %1043 }
 0x24d   : > { %v1053_v52 = vsel %vm1008_vm2, %v1030_v46, %v1042_v50  ;;  %v1054_v53 = vsel %vm1008_vm2, %v1032_v47, %v1044_v51 }
 0x24e   : > { %v1061_v55 = vmul.f32 %v1053_v52, %v2737_v49  ;;  %v1062_v57 = vmul.f32 %v1054_v53, %v2737_v49  ;;  %v1269_v53 = vand.u32 127, %v555_v18 }
 0x250   : > { %v1065_v58 = vadd.f32 %v1061_v55, %v1057_v54  ;;  %v1066_v59 = vadd.f32 %v1062_v57, %v1058_v56  ;;  %v985_v60 = vpop.permute.xlu0 %984  ;;  %v987_v61 = vpop.permute.xlu1 %986  ;;  %vm1270_vm4 = vcmp.le.s32.totalorder %v1269_v53, %v2663_v22 }
 0x252   : > { %v1073_v62 = vpack.c.bf16 %v1065_v58, %v1065_v58  ;;  %v1074_v63 = vpack.c.bf16 %v1066_v59, %v1066_v59 }
 0x254   : > { %v997_v1 = vpop.permute.xlu0 %996  ;;  %v999_v2 = vpop.permute.xlu1 %998  ;;  %v1082_v3 = vsel %vm1077_vm3, %v1073_v62, 0  ;;  %v1128_v4 = vsel %vm1077_vm3, %v1074_v63, 0 }
 0x255   : > { %v1009_v5 = vsel %vm1008_vm2, %v985_v60, %v997_v1  ;;  %v1010_v8 = vsel %vm1008_vm2, %v987_v61, %v999_v2  ;;  %1961 = vmatpush3.bf16.xpose.msra.mxu1 %v1082_v3  ;;  %1967 = vmatpush3.bf16.xpose.msra.mxu0 %v1128_v4 }
 0x256   : > { %v1017_v9 = vmul.f32 %v1009_v5, %v2737_v49  ;;  %v1018_v6 = vmul.f32 %v1010_v8, %v2737_v49  ;;  %1972 = vmatprep.subr.bf16.mxu1 %v2395_v0  ;;  %1978 = vmatprep.subr.bf16.mxu0 %v2395_v0 }
 0x258   : > { %v1021_v11 = vadd.f32 %v1017_v9, %v1013_v7  ;;  %v1022_v12 = vadd.f32 %v1018_v6, %v1014_v10  ;;  %v1034_v13 = vpop.permute.xlu0 %1033  ;;  %v1036_v14 = vpop.permute.xlu1 %1035 }
 0x25a   : > { %v1069_v15 = vpack.c.bf16 %v1021_v11, %v1021_v11  ;;  %v1070_v16 = vpack.c.bf16 %v1022_v12, %v1022_v12 }
 0x25c   : > { %v1046_v17 = vpop.permute.xlu0 %1045  ;;  %1963 = vmatmul.mubr.msk.bf16.vlgmr.msra.gmra.mxu1 %vm1077_vm3, %v1069_v15  ;;  %1969 = vmatmul.mubr.msk.bf16.vlgmr.msra.gmra.mxu0 %vm1077_vm3, %v1070_v16  ;;  %v1048_v19 = vpop.permute.xlu1 %1047 }
 0x25d   : > { %v1055_v20 = vsel %vm1008_vm2, %v1034_v13, %v1046_v17  ;;  %v1056_v21 = vsel %vm1008_vm2, %v1036_v14, %v1048_v19  ;;  %1974 = vmatprep.mubr.msk.bf16.mxu1 %vm2396_vm0, %v2395_v0  ;;  %1980 = vmatprep.mubr.msk.bf16.mxu0 %vm2396_vm0, %v2395_v0 }
 0x25e   : > { %v1063_v24 = vmul.f32 %v1055_v20, %v2737_v49  ;;  %v1064_v27 = vmul.f32 %v1056_v21, %v2737_v49 }
 0x260   : > { %v1067_v28 = vadd.f32 %v1063_v24, %v1059_v23  ;;  %v1068_v29 = vadd.f32 %v1064_v27, %v1060_v25  ;;  %v989_v30 = vpop.permute.xlu0 %988  ;;  %v991_v31 = vpop.permute.xlu1 %990 }
 0x262   : > { %v1075_v32 = vpack.c.bf16 %v1067_v28, %v1067_v28  ;;  %v1076_v34 = vpack.c.bf16 %v1068_v29, %v1068_v29 }
 0x264   : > { %v1001_v35 = vpop.permute.xlu0 %1000  ;;  %v1003_v36 = vpop.permute.xlu1 %1002  ;;  %v1174_v37 = vsel %vm1077_vm3, %v1075_v32, 0  ;;  %v1220_v40 = vsel %vm1077_vm3, %v1076_v34, 0 }
 0x265   : > { %v1011_v41 = vsel %vm1008_vm2, %v989_v30, %v1001_v35  ;;  %v1012_v38 = vsel %vm1008_vm2, %v991_v31, %v1003_v36  ;;  %1973 = vmatpush3.bf16.xpose.msra.mxu1 %v1174_v37  ;;  %1979 = vmatpush3.bf16.xpose.msra.mxu0 %v1220_v40 }
 0x266   : > { %v1019_v42 = vmul.f32 %v1011_v41, %v2737_v49  ;;  %v1020_v46 = vmul.f32 %v1012_v38, %v2737_v49  ;;  %1984 = vmatprep.subr.bf16.mxu1 %v2395_v0  ;;  %1990 = vmatprep.subr.bf16.mxu0 %v2395_v0  ;;  %v537_v49 = vpop.f32.mrf.mxu0 }
 0x268   : > { %v1023_v47 = vadd.f32 %v1019_v42, %v1015_v39  ;;  %v1024_v50 = vadd.f32 %v1020_v46, %v1016_v43  ;;  %v1959_v52 = vpop.f32.mrf.mxu0 }
 0x26a   : > { %v1071_v45 = vpack.c.bf16 %v1023_v47, %v1023_v47  ;;  %v1072_v51 = vpack.c.bf16 %v1024_v50, %v1024_v50 }
 0x26c   : > { %1975 = vmatmul.mubr.msk.bf16.vlgmr.msra.gmra.mxu1 %vm1077_vm3, %v1071_v45  ;;  %1981 = vmatmul.mubr.msk.bf16.vlgmr.msra.gmra.mxu0 %vm1077_vm3, %v1072_v51 }
 0x26d   : > { %1986 = vmatprep.mubr.msk.bf16.mxu1 %vm2396_vm0, %v2395_v0  ;;  %1992 = vmatprep.mubr.msk.bf16.mxu0 %vm2396_vm0, %v2395_v0 }
 0x31c   : > { %v1118_v54 = vpop.f32.mrf.mxu1  ;;  %v1164_v55 = vpop.f32.mrf.mxu0 }
 0x31d   : > { %v1262_v56 = vmul.f32 0.35355338, %v1118_v54  ;;  %v1263_v57 = vmul.f32 0.35355338, %v1164_v55 }
 0x31e   : > { %v1964_v58 = vpop.f32.mrf.mxu1  ;;  %v1970_v59 = vpop.f32.mrf.mxu0 }
 0x31f   : > { %v1271_v60 = vsel %vm1270_vm4, %v1262_v56, -inf  ;;  %v1272_v61 = vsel %vm1270_vm4, %v1263_v57, -inf }
 0x320   : > { %v1121_v62 = vpop.f32.mrf.mxu1  ;;  %v1167_v63 = vpop.f32.mrf.mxu0  ;;  %v1275_v1 = vsel %vm1077_vm3, %v1271_v60, -inf  ;;  %v1278_v18 = vsel %vm1077_vm3, %v1272_v61, -inf }
 0x321   : > { %1276 = vmax.xlane.f32.xlu0 %v1275_v1  ;;  %1279 = vmax.xlane.f32.xlu1 %v1278_v18 }
 0x322   : > { %v1965_v2 = vpop.f32.mrf.mxu1  ;;  %v1971_v3 = vpop.f32.mrf.mxu0 }
 0x32c   : > { %v1210_v4 = vpop.f32.mrf.mxu1  ;;  %v1256_v5 = vpop.f32.mrf.mxu0 }
 0x32d   : > { %v1264_v7 = vmul.f32 0.35355338, %v1210_v4  ;;  %v1265_v8 = vmul.f32 0.35355338, %v1256_v5 }
 0x32e   : > { %v1976_v9 = vpop.f32.mrf.mxu1  ;;  %v1982_v10 = vpop.f32.mrf.mxu0 }
 0x32f   : > { %v1273_v6 = vsel %vm1270_vm4, %v1264_v7, -inf  ;;  %v1274_v14 = vsel %vm1270_vm4, %v1265_v8, -inf }
 0x330   : > { %v1213_v11 = vpop.f32.mrf.mxu1  ;;  %v1259_v12 = vpop.f32.mrf.mxu0  ;;  %v1281_v13 = vsel %vm1077_vm3, %v1273_v6, -inf  ;;  %v1284_v17 = vsel %vm1077_vm3, %v1274_v14, -inf }
 0x331   : > { %1282 = vmax.xlane.f32.xlu0 %v1281_v13 }
 0x332   : > { %v1977_v15 = vpop.f32.mrf.mxu1  ;;  %833 = vrot.lane.b32.xlu1 %v2787_v44, %s2398_s28  ;;  %v1983_v16 = vpop.f32.mrf.mxu0  ;;  %s2889_s28 = scalar_lea.hbm %s2940_s7, %s1905_s20 }
 0x335   : > { %1285 = vmax.xlane.f32.xlu0 %v1284_v17 }
 0x3aa   : > { %v1277_v19 = vpop.xlane.xlu0 %1276  ;;  %v1280_v20 = vpop.xlane.xlu1 %1279 }
 0x3ab   : > { %v1287_v21 = vsub.f32 %v1271_v60, %v1277_v19  ;;  %v1288_v23 = vsub.f32 %v1272_v61, %v1280_v20 }
 0x3ad   : > { %v1291_v24 = vmul.f32 1.442695, %v1287_v21  ;;  %v1293_v25 = vmul.f32 1.442695, %v1288_v23 }
 0x3ae   : > { %v834_v38 = vpop.permute.xlu1 %833 }
 0x3af   : > { %2135 = vpow2.f32 %v1291_v24 }
 0x3b0   : > { %2137 = vpow2.f32 %v1293_v25 }
 0x3ba   : > { %v1283_v30 = vpop.xlane.xlu0 %1282 }
 0x3bb   : > { %v1289_v32 = vsub.f32 %v1273_v6, %v1283_v30 }
 0x3bc   : > { %v2805_v27 = vpop.eup %2135 }
 0x3bd   : > { %v2807_v22 = vpop.eup %2137  ;;  %v1299_v28 = vsel %vm1077_vm3, %v2805_v27, 0.0  ;;  %v1295_v35 = vmul.f32 1.442695, %v1289_v32 }
 0x3be   : > { %1300 = vadd.xlane.f32.xlu1 %v1299_v28  ;;  %v1302_v29 = vsel %vm1077_vm3, %v2807_v22, 0.0  ;;  %v1286_v31 = vpop.xlane.xlu0 %1285 }
 0x3bf   : > { %1303 = vadd.xlane.f32.xlu0 %v1302_v29  ;;  %v1290_v34 = vsub.f32 %v1274_v14, %v1286_v31  ;;  %2139 = vpow2.f32 %v1295_v35 }
 0x3c1   : > { %v1297_v36 = vmul.f32 1.442695, %v1290_v34 }
 0x3c3   : > { %2141 = vpow2.f32 %v1297_v36 }
 0x3cc   : > { %v2817_v37 = vpop.eup %2139 }
 0x3cd   : > { %v1305_v39 = vsel %vm1077_vm3, %v2817_v37, 0.0 }
 0x3cf   : > { %839 = vrot.lane.b32.xlu1 %v2787_v44, %s2397_s8 }
 0x3d0   : > { %v2819_v40 = vpop.eup %2141 }
 0x3d1   : > { %v1308_v41 = vsel %vm1077_vm3, %v2819_v40, 0.0 }
 0x3d5   : > { %836 = vrot.lane.b32.xlu0 %v2787_v44, %s2399_s19  ;;  %s1727_s19 = scalar_lea.sflag [#allocation4], %s2613_s16 }
 0x3f3   : > { %1306 = vadd.xlane.f32.xlu1 %v1305_v39 }
 0x3f4   : > { %1309 = vadd.xlane.f32.xlu0 %v1308_v41 }
 0x447   : > { %v1301_v42 = vpop.xlane.xlu1 %1300 }
 0x448   : > { %v1304_v43 = vpop.xlane.xlu0 %1303  ;;  %2143 = vrcp.f32 %v1301_v42 }
 0x449   : > { %2145 = vrcp.f32 %v1304_v43 }
 0x44b   : > { %v840_v46 = vpop.permute.xlu1 %839 }
 0x44c   : > { %v858_v47 = vcombine.low %v834_v38, %v840_v46  ;;  %v859_v50 = vcombine.high %v834_v38, %v840_v46  ;;  %v837_v45 = vpop.permute.xlu0 %836 }
 0x44d   : > { %v842_v51 = vcombine.low %v2787_v44, %v837_v45  ;;  %v843_v48 = vcombine.high %v2787_v44, %v837_v45 }
 0x44e   : > { %v866_v49 = vrot.slane %v858_v47, %v2666_v26  ;;  %v873_v52 = vrot.slane %v859_v50, %v2666_v26 }
 0x44f   : > { %v850_v53 = vrot.slane %v842_v51, %v2666_v26  ;;  %v857_v54 = vrot.slane %v843_v48, %v2666_v26 }
 0x451   : > { %v874_v55 = vcombine.low %v850_v53, %v866_v49  ;;  %v875_v56 = vcombine.high %v850_v53, %v866_v49  ;;  %v890_v57 = vcombine.low %v857_v54, %v873_v52  ;;  %v891_v58 = vcombine.high %v857_v54, %v873_v52 }
 0x453   : > { %v882_v59 = vrot.slane %v874_v55, %v2669_v33  ;;  %v889_v60 = vrot.slane %v875_v56, %v2669_v33  ;;  %v898_v44 = vrot.slane %v890_v57, %v2669_v33  ;;  %v905_v61 = vrot.slane %v891_v58, %v2669_v33 }
 0x455   : > { %v910_v62 = vcombine.low %v882_v59, %v889_v60  ;;  %v1889_v63 = vcombine.high %v882_v59, %v889_v60  ;;  %v926_v1 = vcombine.low %v898_v44, %v905_v61  ;;  %v1890_v18 = vcombine.high %v898_v44, %v905_v61  ;;  %v2144_v6 = vpop.eup %2143 }
 0x456   : > { %v2146_v15 = vpop.eup %2145  ;;  %v1315_v24 = vmul.f32 %v2144_v6, %v2805_v27 }
 0x457   : > { %v917_v2 = vrot.slane %v910_v62, %v2666_v26  ;;  %v925_v3 = vrot.slane %v1889_v63, %v2666_v26  ;;  %v933_v4 = vrot.slane %v926_v1, %v2666_v26  ;;  %v941_v5 = vrot.slane %v1890_v18, %v2666_v26 }
 0x458   : > { %v1316_v25 = vmul.f32 %v2146_v15, %v2807_v22  ;;  %v1319_v32 = vpack.c.bf16 %v1315_v24, %v1315_v24 }
 0x459   : > { %v942_v7 = vcombine.low %v917_v2, %v925_v3  ;;  %v958_v8 = vcombine.low %v933_v4, %v941_v5  ;;  %v943_v9 = vcombine.high %v917_v2, %v925_v3  ;;  %v959_v10 = vcombine.high %v933_v4, %v941_v5 }
 0x45a   : > { %v1320_v34 = vpack.c.bf16 %v1316_v25, %v1316_v25 }
 0x45b   : > { %v950_v11 = vrot.slane %v942_v7, %v2669_v33  ;;  %v966_v12 = vrot.slane %v958_v8, %v2669_v33  ;;  %v957_v13 = vrot.slane %v943_v9, %v2669_v33  ;;  %v973_v14 = vrot.slane %v959_v10, %v2669_v33  ;;  %v2133_v7 = vld [vmem:[#allocation10 + $0x8] sm:$0xff]  }
 0x45d   : > { %v974_v16 = vcombine.low %v950_v11, %v966_v12  ;;  %v975_v17 = vcombine.high %v950_v11, %v966_v12  ;;  %v976_v19 = vcombine.low %v957_v13, %v973_v14  ;;  %v977_v20 = vcombine.high %v957_v13, %v973_v14 }
 0x45f   : > { %v1323_v21 = vpack.c.bf16 %v974_v16, %v974_v16  ;;  %v1324_v23 = vpack.c.bf16 %v975_v17, %v975_v17  ;;  %v1325_v30 = vpack.c.bf16 %v976_v19, %v976_v19  ;;  %v1326_v31 = vpack.c.bf16 %v977_v20, %v977_v20  ;;  %v2134_v16 = vld [vmem:[#allocation10] sm:$0xff]  }
 0x461   : > { %v1332_v28 = vsel %vm1330_vm5, %v1323_v21, 0  ;;  %v1378_v29 = vsel %vm1330_vm5, %v1324_v23, 0  ;;  %v1424_v27 = vsel %vm1330_vm5, %v1325_v30, 0  ;;  %v1470_v22 = vsel %vm1330_vm5, %v1326_v31, 0 }
 0x462   : > { %1985 = vmatpush3.bf16.msra.mxu1 %v1332_v28  ;;  %1991 = vmatpush3.bf16.msra.mxu0 %v1378_v29 }
 0x463   : > { %1996 = vmatprep.subr.bf16.mxu1 %v2395_v0  ;;  %2002 = vmatprep.subr.bf16.mxu0 %v2395_v0 }
 0x465   : > { %1987 = vmatmul.mubr.msk.bf16.vlgmr.msra.gmra.mxu1 %vm1077_vm3, %v1319_v32  ;;  %1993 = vmatmul.mubr.msk.bf16.vlgmr.msra.gmra.mxu0 %vm1077_vm3, %v1320_v34 }
 0x466   : > { %1997 = vmatpush3.bf16.msra.mxu1 %v1424_v27  ;;  %2003 = vmatpush3.bf16.msra.mxu0 %v1470_v22 }
 0x467   : > { %1998 = vmatprep.mubr.msk.bf16.mxu1 %vm2396_vm0, %v2395_v0  ;;  %2004 = vmatprep.mubr.msk.bf16.mxu0 %vm2396_vm0, %v2395_v0 }
 0x468   : > { %2008 = vmatprep.subr.bf16.mxu1 %v2395_v0 }
 0x47c   : > { %v1307_v35 = vpop.xlane.xlu1 %1306 }
 0x47d   : > { %2147 = vrcp.f32 %v1307_v35  ;;  %v1310_v36 = vpop.xlane.xlu0 %1309 }
 0x47e   : > { %2149 = vrcp.f32 %v1310_v36 }
 0x48a   : > { %v2148_v39 = vpop.eup %2147 }
 0x48b   : > { %v2150_v41 = vpop.eup %2149  ;;  %v1317_v38 = vmul.f32 %v2148_v39, %v2817_v37 }
 0x48c   : > { %v1318_v42 = vmul.f32 %v2150_v41, %v2819_v40 }
 0x48d   : > { %v1321_v43 = vpack.c.bf16 %v1317_v38, %v1317_v38 }
 0x48e   : > { %v1322_v46 = vpack.c.bf16 %v1318_v42, %v1318_v42 }
 0x48f   : > { %1999 = vmatmul.mubr.msk.bf16.vlgmr.msra.gmra.mxu1 %vm1077_vm3, %v1321_v43 }
 0x490   : > { %2005 = vmatmul.mubr.msk.bf16.vlgmr.msra.gmra.mxu0 %vm1077_vm3, %v1322_v46  ;;  %2012 = vmatprep.mubr.msk.bf16.mxu1 %vm2396_vm0, %v2395_v0 }
 0x491   : > { %2009 = vmatpush3.bf16.msra.mxu1 %v2133_v7 }
 0x492   : > { %2010 = vmatprep.subr.bf16.mxu1 %v2395_v0 }
 0x495   : > { %2011 = vmatpush3.bf16.msra.mxu1 %v2134_v16 }
 0x525   : > { %v1368_v47 = vpop.f32.mrf.mxu1  ;;  %v1414_v50 = vpop.f32.mrf.mxu0 }
 0x527   : > { %v1988_v45 = vpop.f32.mrf.mxu1  ;;  %v1994_v51 = vpop.f32.mrf.mxu0 }
 0x529   : > { %v1371_v48 = vpop.f32.mrf.mxu1  ;;  %v1417_v49 = vpop.f32.mrf.mxu0 }
 0x52b   : > { %v1989_v52 = vpop.f32.mrf.mxu1  ;;  %v1995_v53 = vpop.f32.mrf.mxu0 }
 0x54f   : > { %v1460_v37 = vpop.f32.mrf.mxu1 }
 0x550   : > { %v1512_v54 = vcombine.low %v1368_v47, %v1460_v37  ;;  %v1513_v40 = vcombine.high %v1368_v47, %v1460_v37  ;;  %v1506_v55 = vpop.f32.mrf.mxu0 }
 0x551   : > { %v1528_v56 = vcombine.low %v1414_v50, %v1506_v55  ;;  %v1529_v57 = vcombine.high %v1414_v50, %v1506_v55  ;;  %v2000_v58 = vpop.f32.mrf.mxu1 }
 0x552   : > { %v1520_v59 = vrot.slane %v1512_v54, %v2666_v26  ;;  %v1527_v60 = vrot.slane %v1513_v40, %v2666_v26  ;;  %v2006_v44 = vpop.f32.mrf.mxu0 }
 0x553   : > { %v1536_v61 = vrot.slane %v1528_v56, %v2666_v26  ;;  %v1543_v62 = vrot.slane %v1529_v57, %v2666_v26  ;;  %v1463_v63 = vpop.f32.mrf.mxu1 }
 0x554   : > { %v1509_v1 = vpop.f32.mrf.mxu0 }
 0x555   : > { %v1544_v18 = vcombine.low %v1520_v59, %v1536_v61  ;;  %v1545_v2 = vcombine.high %v1520_v59, %v1536_v61  ;;  %v1560_v3 = vcombine.low %v1527_v60, %v1543_v62  ;;  %v1561_v4 = vcombine.high %v1527_v60, %v1543_v62  ;;  %v2001_v5 = vpop.f32.mrf.mxu1 }
 0x556   : > { %v2007_v8 = vpop.f32.mrf.mxu0 }
 0x557   : > { %v1552_v9 = vrot.slane %v1544_v18, %v2669_v33  ;;  %v1559_v10 = vrot.slane %v1545_v2, %v2669_v33  ;;  %v1568_v6 = vrot.slane %v1560_v3, %v2669_v33  ;;  %v1575_v11 = vrot.slane %v1561_v4, %v2669_v33 }
 0x559   : > { %v1580_v12 = vcombine.low %v1552_v9, %v1559_v10  ;;  %v1899_v13 = vcombine.high %v1552_v9, %v1559_v10  ;;  %v1596_v14 = vcombine.low %v1568_v6, %v1575_v11  ;;  %v1900_v15 = vcombine.high %v1568_v6, %v1575_v11 }
 0x55b   : > { %v1587_v17 = vrot.slane %v1580_v12, %v2666_v26  ;;  %v1595_v19 = vrot.slane %v1899_v13, %v2666_v26  ;;  %v1603_v20 = vrot.slane %v1596_v14, %v2666_v26  ;;  %v1611_v21 = vrot.slane %v1900_v15, %v2666_v26 }
 0x55d   : > { %v1613_v23 = vcombine.high %v1587_v17, %v1595_v19  ;;  %v1629_v24 = vcombine.high %v1603_v20, %v1611_v21  ;;  %v1612_v25 = vcombine.low %v1587_v17, %v1595_v19  ;;  %v1628_v28 = vcombine.low %v1603_v20, %v1611_v21 }
 0x55f   : > { %v1627_v0 = vrot.slane %v1613_v23, %v2669_v33  ;;  %v1643_v29 = vrot.slane %v1629_v24, %v2669_v33  ;;  %v1620_v30 = vrot.slane %v1612_v25, %v2669_v33  ;;  %v1636_v31 = vrot.slane %v1628_v28, %v2669_v33 }
 0x561   : > { %v1646_v32 = vcombine.low %v1627_v0, %v1643_v29  ;;  %v1645_v34 = vcombine.high %v1620_v30, %v1636_v31  ;;  %v1644_v27 = vcombine.low %v1620_v30, %v1636_v31  ;;  %v1647_v26 = vcombine.high %v1627_v0, %v1643_v29 }
 0x563   : > { %1653 = vrot.lane.b32.xlu1 %v1646_v32, %s2404_s18  ;;  %1649 = vrot.lane.b32.xlu0 %v1645_v34, %s2405_s13 }
 0x567   : > { %1657 = vrot.lane.b32.xlu1 %v1647_v26, %s2406_s12 }
 0x5d5   : > { %v1654_v22 = vpop.permute.xlu1 %1653  ;;  %v1650_v35 = vpop.permute.xlu0 %1649 }
 0x5d6   : > { %v1660_v36 = vsel %vm1077_vm3, %v1644_v27, %v1650_v35 }
 0x5d7   : > { %v1662_v39 = vsel %vm1661_vm6, %v1660_v36, %v1654_v22 }
 0x5d9   : > { %v1658_v33 = vpop.permute.xlu1 %1657 }
 0x5da   : > { %v1664_v41 = vsel %vm1663_vm7, %v1662_v39, %v1658_v33 }
 0x5db   : > { %v1665_v38 = vpack.c.bf16 %v1664_v41, %v1664_v41 }
 0x5dd   : > { %2013 = vmatmul.mubr.msk.bf16.vlgmr.msra.gmra.mxu1 %vm384_vm1, %v1665_v38 }
 0x69d   : > { %v1719_v42 = vpop.f32.mrf.mxu1 }
 0x69e   : > { %1725 = vst.msk [vmem:[%s364_s9] sm:$0xff] %vm384_vm1, %v1719_v42 }
 0x69f   : > { %v2014_v43 = vpop.f32.mrf.mxu1 }
 0x6a0   : > { %2322 = shalt.err (!%p2319_p1)
}
 0x6a1   : > { %s2323_s14 = scalar_lea.hbm %s2889_s28, 128  ;;  %s2327_s18 = scalar_lea.hbm %s2940_s7, 256 }
 0x6a2   : > { %p2324_p3 = scmp.ne.s32.totalorder %s2889_s28, %s2323_s14  ;;  %p2328_p6 = scmp.lt.s32.totalorder %s2889_s28, %s2940_s7 }
 0x6a3   : > { %p2329_p2 = scmp.lt.s32.totalorder %s2327_s18, %s2323_s14 }
 0x6a4   : > { %p2325_p4 = pnand %p2324_p3, %p2964_p11 }
 0x6a5   : > { %p2330_p7 = por %p2329_p2, %p2328_p6 }
 0x6a6   : > { %p2326_p12 = pneg %p2325_p4 }
 0x6a8   : > { %p2331_p8 = pnand %p2330_p7, %p2326_p12 }
 0x6aa   : > { %2334 = shalt.err (!%p2331_p8)
}
 0x6ab   : > { %2038 = dma.vmem_to_hbm [thread:$0]  (%p2964_p11), %s2891_s1, 128, %s2889_s28, %s1727_s19   ;;  %v1722_v46 = vpop.f32.mrf.mxu1 }
 0x6ad   : > { %v2015_v47 = vpop.f32.mrf.mxu1 }
 0x6ae PF: > { %s1752_s20 = sand.u32 1, %s2373_s24   ;;  %p2965_p0 = scmp.ne.s32.totalorder %s2954_s10, 0 }
 0x6af   : > { %p2966_p13 = scmp.ge.s32.totalorder %s2385_s27, 2  ;;  %s1753_s9 = scalar_lea.sflag [#allocation4], %s1752_s20 }
 0x6b1   : > { %p2061_p5 = pnand %p2966_p13, %p2965_p0 }
 0x6b3   : > { %p2062_p9 = pneg %p2061_p5 }
 0x6b5   : > { %2368 = dma.done.wait (%p2062_p9), %s1753_s9, 128  }
 0x6b6   : > { %2370 = vsyncadd (%p2062_p9), %s1753_s9, 4294967168  ;;  %p23_p11 = scmp.ge.s32.totalorder %s2556_s11, 4   ;;  %s2967_s24 = smov %s2377_s25 }
 0x6b7   : > { %s2968_s25 = smov %s2381_s26  ;;  %s2969_s26 = smov %s2568_s23 }
 0x6b8   : > { %s2970_s27 = smov %s2556_s11  ;;  %25 = sbr.rel (!%p23_p11) target bundleno = 11 (0xb), region = 113 }
 0x6bd   :  { %1758 = vsyncpa [#allocation3], 1 }
 0x6be   :  { %1760 = vsyncpa [#allocation3 + $0x1], 1 }
 0x6bf   :  { %1761 = vsyncpa [#allocation6], 1 }
 0x6c0   :  { %1762 = vsyncpa [#allocation9], 1 }
 0x6c1   :  { %1763 = vsyncpa [#allocation12], 1 }
 0x6c2   :  { %1764 = vsyncpa [#allocation4], 1 }
 0x6c3   :  { %1766 = vsyncpa [#allocation4 + $0x1], 1 }

</bundles_post_ra>
